<compile_context>
chip_gen: v7x
topology: tpu7x:2x2x1
jax: 0.10.0
libtpu: 0.0.40
codegen_flags: <defaults>
</compile_context>

<pallas_src>
import jax
import jax.numpy as jnp
from jax.experimental import pallas as pl
from jax.experimental.pallas import tpu as pltpu


def _attention_gate_kernel(x_ref, g_ref, wx_ref, wg_ref, b_ref, o_ref):
    # x_ref: (Cin, thw)   g_ref: (Cg, thw)
    # wx_ref: (Cin, 1)    wg_ref: (Cg, 1)   b_ref: (1,) in SMEM
    x = x_ref[...]
    g = g_ref[...]

    xf = x.astype(jnp.float32)
    gf = g.astype(jnp.float32)

    # Folded projection: two cheap channel reductions (VPU mul + sublane reduce).
    s = jnp.sum(xf * wx_ref[...], axis=0, keepdims=True)          # (1, thw)
    s = s + jnp.sum(gf * wg_ref[...], axis=0, keepdims=True)      # (1, thw)
    s = s + b_ref[0]                                               # SMEM scalar

    alpha = jax.nn.sigmoid(s)                                      # f32, EUP

    # Gate in the input dtype (halves VALU/store traffic for bf16 inputs).
    o_ref[...] = (x * alpha.astype(x.dtype)).astype(o_ref.dtype)


def _vmem_budget_bytes():
    """Total bytes we allow Pallas' double-buffered stream tiles to occupy."""
    try:
        cap = pltpu.get_tpu_info().vmem_capacity_bytes
    except Exception:  # interpret mode / unknown chip: be conservative
        cap = 64 << 20
    if cap <= (64 << 20):       # v7x-class: 64 MiB physical per TensorCore
        total = 24 << 20
    else:                       # v5e / v6e: 128 MiB physical
        total = 48 << 20
    return total, cap


def _round_down_128(v):
    return max(128, (v // 128) * 128)


def _pick_tile(hw_padded, bytes_per_pixel, itemsize, n_batch):
    """Pick the pixel-tile width (multiple of 128, or full padded HW)."""
    total_budget, _ = _vmem_budget_bytes()
    # total_budget covers double-buffered x + g + out tiles.
    max_thw = _round_down_128(total_budget // max(1, 2 * bytes_per_pixel))

    if hw_padded <= max_thw:
        thw = hw_padded                      # one contiguous DMA per stream/batch
    else:
        thw = max_thw
        # prefer a tile that divides hw_padded (no ragged last tile), but don't
        # shrink below half of the budgeted tile to find one.
        t = max_thw
        while t >= max(128, max_thw // 2):
            if hw_padded % t == 0:
                thw = t
                break
            t -= 128
        # keep each strided channel run >= ~4 KB so HBM runs stay long
        min_run = min(hw_padded, _round_down_128(-(-4096 // itemsize)))
        thw = max(thw, min_run)

    # Make sure the "parallel" grid has >= 2 steps (v7x has 2 TensorCores);
    # a (1, 1) grid would idle half the chip's HBM bandwidth.
    if n_batch == 1 and thw >= hw_padded and hw_padded >= 256:
        thw = max(128, ((hw_padded // 2 + 127) // 128) * 128)

    return min(thw, hw_padded)


def attention_gate_pallas(x_nchw, g_nchw, params):
    """x_nchw: (N, Cin, H, W), g_nchw: (N, Cg, H, W) -> (N, Cin, H, W)."""
    N, Cin, H, W = x_nchw.shape
    _, Cg, _, _ = g_nchw.shape
    HW = H * W

    # --- fold psi into theta/phi (valid: no nonlinearity between add and psi) ---
    wt = params["wt"].astype(jnp.float32)        # (Cin, Co)
    bt = params["bt"].astype(jnp.float32)        # (Co,)
    wp = params["wp"].astype(jnp.float32)        # (Cg, Co)
    bp = params["bp"].astype(jnp.float32)        # (Co,)
    wpsi = params["wpsi"].astype(jnp.float32)    # (Co, 1)
    bpsi = params["bpsi"].astype(jnp.float32)    # (1,)

    wx_fold = wt @ wpsi                          # (Cin, 1)
    wg_fold = wp @ wpsi                          # (Cg, 1)
    b_fold = ((bt + bp) @ wpsi + bpsi).reshape(1,)   # (1,) scalar, SMEM

    # --- free reshapes, keep NCHW layout (pixels on the lane axis) ---
    x_flat = x_nchw.reshape(N, Cin, HW)
    g_flat = g_nchw.reshape(N, Cg, HW)

    # Pad the pixel axis to a multiple of 128 so every block/store is lane-dense.
    HW_pad = ((HW + 127) // 128) * 128
    if HW_pad != HW:
        pad = HW_pad - HW
        x_flat = jnp.pad(x_flat, ((0, 0), (0, 0), (0, pad)))
        g_flat = jnp.pad(g_flat, ((0, 0), (0, 0), (0, pad)))

    itemsize = jnp.dtype(x_flat.dtype).itemsize
    bytes_per_pixel = (2 * Cin + Cg) * itemsize          # x read + g read + out write
    thw = _pick_tile(HW_pad, bytes_per_pixel, itemsize, N)
    grid = (N, pl.cdiv(HW_pad, thw))

    # Explicit scoped-VMEM limit sized for the chosen (double-buffered) tiles.
    _, vmem_cap = _vmem_budget_bytes()
    buffers_bytes = 2 * bytes_per_pixel * thw
    vmem_limit = int(min(vmem_cap - (8 << 20),
                         max(32 << 20, buffers_bytes * 5 // 4 + (2 << 20))))

    cost = pl.CostEstimate(
        flops=2 * N * HW * (Cin + Cg) + N * HW * Cin,
        transcendentals=N * HW,
        bytes_accessed=(x_flat.size + g_flat.size + x_flat.size) * itemsize,
    )

    out_flat = pl.pallas_call(
        _attention_gate_kernel,
        out_shape=jax.ShapeDtypeStruct((N, Cin, HW_pad), x_flat.dtype),
        grid_spec=pltpu.PrefetchScalarGridSpec(
            num_scalar_prefetch=0,
            grid=grid,
            in_specs=[
                pl.BlockSpec((pl.Squeezed(), Cin, thw), lambda n, i: (n, 0, i)),  # x
                pl.BlockSpec((pl.Squeezed(), Cg, thw), lambda n, i: (n, 0, i)),   # g
                pl.BlockSpec((Cin, 1), lambda n, i: (0, 0)),                      # wt@wpsi
                pl.BlockSpec((Cg, 1), lambda n, i: (0, 0)),                       # wp@wpsi
                pl.BlockSpec(memory_space=pltpu.MemorySpace.SMEM),                # folded bias
            ],
            out_specs=pl.BlockSpec((pl.Squeezed(), Cin, thw), lambda n, i: (n, 0, i)),
        ),
        compiler_params=pltpu.CompilerParams(
            dimension_semantics=("parallel", "parallel"),
            vmem_limit_bytes=vmem_limit,
        ),
        cost_estimate=cost,
    )(x_flat, g_flat, wx_fold, wg_fold, b_fold)

    if HW_pad != HW:
        out_flat = out_flat[:, :, :HW]
    return out_flat.reshape(N, Cin, H, W)


def attention_gate_ref(x_nchw, g_nchw, params):
    """Pure-JAX reference (matches the PyTorch forward exactly)."""
    def conv1x1(t, w, b):  # t: NCHW, w: (Cin, Cout), b: (Cout,)
        y = jnp.einsum("nchw,co->nohw", t, w)
        return y + b[None, :, None, None]

    theta = conv1x1(x_nchw, params["wt"], params["bt"])
    phi = conv1x1(g_nchw, params["wp"], params["bp"])
    f = theta + phi
    s = conv1x1(f, params["wpsi"], params["bpsi"])
    alpha = jax.nn.sigmoid(s)
    return x_nchw * alpha


def init_params(key, in_channels, g_channels, out_channels, dtype=jnp.float32):
    ks = jax.random.split(key, 6)
    scale = 0.1
    return {
        "wt": scale * jax.random.normal(ks[0], (in_channels, out_channels), dtype),
        "bt": scale * jax.random.normal(ks[1], (out_channels,), dtype),
        "wp": scale * jax.random.normal(ks[2], (g_channels, out_channels), dtype),
        "bp": scale * jax.random.normal(ks[3], (out_channels,), dtype),
        "wpsi": scale * jax.random.normal(ks[4], (out_channels, 1), dtype),
        "bpsi": scale * jax.random.normal(ks[5], (1,), dtype),
    }


if __name__ == "__main__":
    key = jax.random.PRNGKey(0)
    k_x, k_g, k_p = jax.random.split(key, 3)

    N, Cin, Cg, Co, H, W = 2, 4, 8, 16, 16, 16
    x = jax.random.normal(k_x, (N, Cin, H, W), jnp.float32)
    g = jax.random.normal(k_g, (N, Cg, H, W), jnp.float32)
    params = init_params(k_p, Cin, Cg, Co)

    out = attention_gate_pallas(x, g, params)
    out = jax.block_until_ready(out)

    ref = attention_gate_ref(x, g, params)
    assert out.shape == (N, Cin, H, W)
    assert jnp.allclose(out, ref, atol=1e-5, rtol=1e-5), "mismatch vs reference"

    print("KERNEL_OK")
</pallas_src>

<mosaic_0001>
module attributes {stable_mosaic.version = 11 : i64} {
  func.func @_attention_gate_kernel(%arg0: i32, %arg1: i32, %arg2: memref<1x4x256xf32, #tpu.memory_space<vmem>>, %arg3: memref<1x8x256xf32, #tpu.memory_space<vmem>>, %arg4: memref<4x1xf32, #tpu.memory_space<vmem>>, %arg5: memref<8x1xf32, #tpu.memory_space<vmem>>, %arg6: memref<1xf32, #tpu.memory_space<smem>>, %arg7: memref<1x4x256xf32, #tpu.memory_space<vmem>>) attributes {dimension_semantics = [#tpu.dimension_semantics<parallel>, #tpu.dimension_semantics<parallel>], iteration_bounds = array<i64: 2, 1>, scalar_prefetch = 0 : i64, scratch_operands = 0 : i64, tpu.core_type = #tpu.core_type<tc>, window_params = [{transform_indices = @transform_0, window_bounds = array<i64: 1, 4, 256>}, {transform_indices = @transform_1, window_bounds = array<i64: 1, 8, 256>}, {pipeline_mode = #tpu.pipeline_mode<synchronous>, transform_indices = @transform_2, window_bounds = array<i64: 4, 1>}, {pipeline_mode = #tpu.pipeline_mode<synchronous>, transform_indices = @transform_3, window_bounds = array<i64: 8, 1>}, {transform_indices = @transform_4, window_bounds = array<i64: 1>}, {transform_indices = @transform_5, window_bounds = array<i64: 1, 4, 256>}]} {
    %c0 = arith.constant 0 : index
    %c0_0 = arith.constant 0 : index
    %c0_1 = arith.constant 0 : index
    %0 = vector.load %arg2[%c0, %c0_0, %c0_1] : memref<1x4x256xf32, #tpu.memory_space<vmem>>, vector<1x4x256xf32>
    %1 = vector.shape_cast %0 : vector<1x4x256xf32> to vector<4x256xf32>
    %c0_2 = arith.constant 0 : index
    %c0_3 = arith.constant 0 : index
    %c0_4 = arith.constant 0 : index
    %2 = vector.load %arg3[%c0_2, %c0_3, %c0_4] : memref<1x8x256xf32, #tpu.memory_space<vmem>>, vector<1x8x256xf32>
    %3 = vector.shape_cast %2 : vector<1x8x256xf32> to vector<8x256xf32>
    %c0_5 = arith.constant 0 : index
    %c0_6 = arith.constant 0 : index
    %4 = vector.load %arg4[%c0_5, %c0_6] : memref<4x1xf32, #tpu.memory_space<vmem>>, vector<4x1xf32>
    %5 = vector.broadcast %4 : vector<4x1xf32> to vector<4x256xf32>
    %6 = arith.mulf %1, %5 : vector<4x256xf32>
    %cst = arith.constant dense<0.000000e+00> : vector<256xf32>
    %7 = vector.multi_reduction <add>, %6, %cst [0] : vector<4x256xf32> to vector<256xf32>
    %8 = vector.shape_cast %7 : vector<256xf32> to vector<1x256xf32>
    %c0_7 = arith.constant 0 : index
    %c0_8 = arith.constant 0 : index
    %9 = vector.load %arg5[%c0_7, %c0_8] : memref<8x1xf32, #tpu.memory_space<vmem>>, vector<8x1xf32>
    %10 = vector.broadcast %9 : vector<8x1xf32> to vector<8x256xf32>
    %11 = arith.mulf %3, %10 : vector<8x256xf32>
    %cst_9 = arith.constant dense<0.000000e+00> : vector<256xf32>
    %12 = vector.multi_reduction <add>, %11, %cst_9 [0] : vector<8x256xf32> to vector<256xf32>
    %13 = vector.shape_cast %12 : vector<256xf32> to vector<1x256xf32>
    %14 = arith.addf %8, %13 : vector<1x256xf32>
    %c0_10 = arith.constant 0 : index
    %15 = memref.load %arg6[%c0_10] : memref<1xf32, #tpu.memory_space<smem>>
    %16 = vector.broadcast %15 : f32 to vector<1x256xf32>
    %17 = arith.addf %14, %16 : vector<1x256xf32>
    %18 = arith.negf %17 : vector<1x256xf32>
    %19 = math.exp %18 : vector<1x256xf32>
    %cst_11 = arith.constant 1.000000e+00 : f32
    %20 = vector.broadcast %cst_11 : f32 to vector<1x256xf32>
    %21 = arith.addf %20, %19 : vector<1x256xf32>
    %22 = arith.divf %20, %21 : vector<1x256xf32>
    %23 = vector.broadcast %22 : vector<1x256xf32> to vector<4x256xf32>
    %24 = arith.mulf %1, %23 : vector<4x256xf32>
    %c0_12 = arith.constant 0 : index
    %c0_13 = arith.constant 0 : index
    %c0_14 = arith.constant 0 : index
    %25 = vector.load %arg7[%c0_12, %c0_13, %c0_14] : memref<1x4x256xf32, #tpu.memory_space<vmem>>, vector<1x4x256xf32>
    %26 = vector.shape_cast %25 : vector<1x4x256xf32> to vector<4x256xf32>
    %27 = vector.shape_cast %24 : vector<4x256xf32> to vector<1x4x256xf32>
    tpu.vector_store %arg7[%c0_12, %c0_13, %c0_14], %27 {strides = array<i32>} : memref<1x4x256xf32, #tpu.memory_space<vmem>>, vector<1x4x256xf32>,
    return
  }
  func.func @transform_0(%arg0: i32, %arg1: i32) -> (i32, i32, i32) {
    %c0_i32 = arith.constant 0 : i32
    %c0_i32_0 = arith.constant 0 : i32
    return %arg0, %c0_i32, %arg1 : i32, i32, i32
  }
  func.func @transform_1(%arg0: i32, %arg1: i32) -> (i32, i32, i32) {
    %c0_i32 = arith.constant 0 : i32
    %c0_i32_0 = arith.constant 0 : i32
    return %arg0, %c0_i32, %arg1 : i32, i32, i32
  }
  func.func @transform_2(%arg0: i32, %arg1: i32) -> (i32, i32) {
    %c0_i32 = arith.constant 0 : i32
    %c0_i32_0 = arith.constant 0 : i32
    %c0_i32_1 = arith.constant 0 : i32
    return %c0_i32, %c0_i32_0 : i32, i32
  }
  func.func @transform_3(%arg0: i32, %arg1: i32) -> (i32, i32) {
    %c0_i32 = arith.constant 0 : i32
    %c0_i32_0 = arith.constant 0 : i32
    %c0_i32_1 = arith.constant 0 : i32
    return %c0_i32, %c0_i32_0 : i32, i32
  }
  func.func @transform_4(%arg0: i32, %arg1: i32) -> i32 {
    %c0_i32 = arith.constant 0 : i32
    %c0_i32_0 = arith.constant 0 : i32
    return %c0_i32 : i32
  }
  func.func @transform_5(%arg0: i32, %arg1: i32) -> (i32, i32, i32) {
    %c0_i32 = arith.constant 0 : i32
    %c0_i32_0 = arith.constant 0 : i32
    return %arg0, %c0_i32, %arg1 : i32, i32, i32
  }
}

</mosaic_0001>

<bundles_post_ra>
// kernel: tpu_custom_call.1
= control target key start
LH: loop header
LB: loop body
LE: loop exit
PB: predicated region body
PF: predicated region fallthrough
CT: control target
= control target key end

     0   :  { %s926_s0 = inlined_call_operand.vmem [shape: f32[2,4,256], index: 0, kind: input, shape index: {}]   ;;  %s927_s1 = inlined_call_operand.hbm [shape: f32[2,8,256], index: 1, kind: input, shape index: {}]   ;;  %s928_s2 = inlined_call_operand.vmem [shape: f32[4,1], index: 2, kind: input, shape index: {}]   ;;  %s929_s3 = inlined_call_operand.vmem [shape: f32[8,1], index: 3, kind: input, shape index: {}]   ;;  %s930_s4 = inlined_call_operand.<no memory space> [shape: f32[1], index: 4, kind: input, shape index: {}]   ;;  %s931_s5 = inlined_call_operand.hbm [shape: f32[2,4,256], index: 5, kind: output, shape index: {}]  }
   0x1   :  { %10 = sst [smem:[#allocation2]] %s930_s4 }
   0x2   :  { %11 = vsyncpa [#allocation4], 0 }
   0x3   :  { %13 = vsyncpa [#allocation4 + $0x1], 0 }
   0x4   :  { %14 = vsyncpa [#allocation5], 0 }
   0x5   :  { %16 = vsyncpa [#allocation5 + $0x1], 0  ;;  %s742_s20 = smov 0   ;;  %s744_s21 = smov 0  }
   0x6   :  { %s746_s22 = smov 0   ;;  %s748_s23 = smov 0  }
   0x7   :  { %s750_s24 = smov 0   ;;  %s752_s25 = smov 0  }
   0x8 LB: > { %s496_s4 = sadd.s32 4294967295, %s703_s25   ;;  %s497_s26 = sadd.s32 4294967294, %s703_s25   ;;  %s703_s25 = sphi %s752_s25, %s22_s25   ;;  %s699_s24 = sphi %s750_s24, %s947_s24   ;;  %s695_s23 = sphi %s748_s23, %s946_s23   ;;  %s691_s22 = sphi %s746_s22, %s945_s22   ;;  %s687_s21 = sphi %s744_s21, %s944_s21   ;;  %s683_s20 = sphi %s742_s20, %s943_s20  }
   0x9   : > { %s34_s27 = sadd.s32 1, %s699_s24  ;;  %s71_s28 = sadd.s32 1, %s691_s22 }
   0xa   : > { %p36_p0 = scmp.ge.s32.totalorder %s34_s27, 2  ;;  %p78_p1 = scmp.ne.s32.totalorder %s691_s22, %s687_s21 }
   0xb   : > { %p79_p2 = scmp.eq.s32.totalorder %s703_s25, 0  ;;  %p84_p3 = scmp.ne.s32.totalorder %s687_s21, %s683_s20 }
   0xc   : > { %s949_s27 = smov (%p36_p0, %s34_s27), 0  ;;  %p85_p5 = scmp.eq.s32.totalorder %s496_s4, 0 }
   0xd   : > { %p783_p4 = por %p79_p2, %p78_p1  ;;  %s66_s30 = ssub.s32 %s699_s24, %s949_s27 }
   0xe   : > { %p173_p6 = scmp.eq.s32.totalorder %s496_s4, 1  ;;  %p69_p7 = scmp.eq.s32.totalorder %s66_s30, 0 }
   0xf   : > { %p789_p8 = por %p85_p5, %p84_p3  ;;  %p179_p10 = scmp.eq.s32.totalorder %s497_s26, 1 }
  0x10   : > { %p793_p9 = por %p173_p6, %p78_p1  ;;  %p530_p13 = scmp.lt.s32.totalorder %s703_s25, 2 }
  0x11   : > { %s798_s8 = scalar_select %p69_p7, %s691_s22, %s71_s28  }
  0x12   : > { %s935_s7 = scalar_select %p793_p9, 1, 0 }
  0x13   : > { %p800_p11 = por %p179_p10, %p84_p3  ;;  %s221_s10 = sand.u32 1, %s691_s22  }
  0x14   : > { %s500_s11 = sshll.u32 %s221_s10, 4  ;;  %s515_s12 = sshll.u32 %s699_s24, 8 }
  0x15   : > { %s936_s9 = scalar_select %p800_p11, 1, 0 }
  0x16   : > { %s811_s15 = scalar_lea.hbm %s927_s1, %s515_s12  ;;  %s225_s16 = scalar_lea.vmem [#allocation3], %s500_s11 }
  0x17   : > { %s235_s17 = sshll.u32 %s225_s16, 4  ;;  %p817_p0 = pnand %p530_p13, %p783_p4  ;;  %s813_s17 = int_to_ptr.vmem [resolvable:$true] %s235_s17 }
  0x18   : > { %s222_s19 = scalar_lea.sflag [#allocation4], %s221_s10  ;;  %s591_s4 = scalar_lea.hbm %s811_s15, 256 }
  0x19   : > { %p592_p3 = scmp.ne.s32.totalorder %s811_s15, %s591_s4  ;;  %p593_p5 = pneg %p817_p0 }
  0x1a   : > { %s596_s29 = scalar_lea.hbm %s927_s1, 512  ;;  %p597_p4 = scmp.lt.u32.totalorder %s811_s15, %s927_s1 }
  0x1b   : > { %p594_p6 = pnand %p593_p5, %p592_p3  ;;  %p598_p10 = scmp.lt.u32.totalorder %s596_s29, %s591_s4 }
  0x1c   : > { %p600_p12 = scmp.lt.u32.totalorder %s591_s4, %s811_s15 }
  0x1d   : > { %p595_p7 = pneg %p594_p6  ;;  %p599_p13 = por %p598_p10, %p597_p4 }
  0x1f   : > { %p601_p1 = por %p600_p12, %p599_p13 }
  0x21   : > { %p602_p2 = pnand %p601_p1, %p595_p7 }
  0x23   : > { %605 = shalt.err (!%p602_p2)
}
  0x24   : > { %s606_s10 = scalar_lea.vmem %s813_s17, 256  ;;  %s705_s12 = smov [#allocation3]  }
  0x25   : > { %p607_p3 = scmp.ne.s32.totalorder %s813_s17, %s606_s10  ;;  %s611_s13 = sshll.u32 %s705_s12, 4  ;;  %s612_s13 = int_to_ptr.vmem [resolvable:$false] %s611_s13 }
  0x26   : > { %s613_s14 = scalar_lea.vmem %s612_s13, 512  ;;  %p614_p9 = scmp.lt.s32.totalorder %s813_s17, %s612_s13 }
  0x27   : > { %p609_p6 = pnand %p607_p3, %p593_p5  ;;  %p615_p4 = scmp.lt.s32.totalorder %s613_s14, %s606_s10 }
  0x29   : > { %p610_p11 = pneg %p609_p6  ;;  %p616_p10 = por %p615_p4, %p614_p9 }
  0x2b   : > { %p617_p12 = pnand %p616_p10, %p610_p11 }
  0x2d   : > { %620 = shalt.err (!%p617_p12)
}
  0x2e   : > { %525 = dma.hbm_to_vmem [thread:$0]  (!%p817_p0), %s811_s15, 256, %s813_s17, %s222_s19  }
  0x2f   : > { %p938_p1 = scmp.lt.s32.totalorder %s703_s25, 3  ;;  %p939_p2 = scmp.ge.s32.totalorder %s703_s25, 1 }
  0x31   : > { %p241_p5 = pnand %p939_p2, %p938_p1 }
  0x32   : > { %s853_s16 = sand.u32 (!%p241_p5), 1, %s687_s21  }
  0x33   : > { %244 = sbr.rel (%p241_p5) target bundleno = 256 (0x100), region = 40  ;;  %s504_s4 = sshll.u32 (!%p241_p5), %s853_s16, 4 }
  0x34   : > { %s247_s26 = scalar_lea.sflag (!%p241_p5), [#allocation4], %s853_s16  ;;  %s250_s28 = scalar_lea.vmem (!%p241_p5), [#allocation3], %s504_s4 }
  0x3a   : > { %674 = dma.done.wait (%p789_p8), %s247_s26, 256  }
  0x3b   : > { %676 = vsyncadd (%p789_p8), %s247_s26, 4294967040  ;;  %v706_v0 = vmov 0   ;;  %v301_v1 = vld [vmem:[%s928_s2] sm:$0xf]  ;;  %p287_p9 = scmp.lt.s32.totalorder %s695_s23, 1  ;;  %v309_v5 = vlaneseq  ;;  %vm318_vm0 = vcmask 1043456  }
  0x3c   : > { %582 = vset.pattern.permute.xlu0 %v706_v0  ;;  %v333_v2 = vld [vmem:[%s929_s3] sm:$0xff]  ;;  %v707_v3 = vmov 839922192   ;;  %v300_v13 = vld [vmem:[%s250_s28 + $0x8] sm:$0xff]  ;;  %s355_s12 = sld [smem:[#allocation2]]  ;;  %s505_s13 = sshll.u32 %s853_s16, 3 }
  0x3d   : > { %304 = vperm.xlu0 %582, %v301_v1   ;;  %v307_v4 = vunpack.c.l.s4 %v707_v3  ;;  %s288_s6 = scalar_select %p287_p9, %s695_s23, 1  ;;  %v310_v7 = vshrl.u32 %v309_v5, 7  ;;  %v299_v12 = vld [vmem:[%s250_s28] sm:$0xff] }
  0x3e   : > { %s517_s14 = sshll.u32 %s695_s23, 7  ;;  %s285_s4 = scalar_lea.vmem [#allocation6], %s505_s13 }
  0x3f   : > { %v308_v6 = vunpack.c.0.s8 %v307_v4  ;;  %s516_s29 = sshll.u32 %s288_s6, 3  ;;  %s394_s26 = sshll.u32 %s285_s4, 4  ;;  %s879_s26 = int_to_ptr.vmem [resolvable:$true] %s394_s26 }
  0x40   : > { %s294_s10 = scalar_lea.vmem %s926_s0, %s516_s29  ;;  %s877_s17 = scalar_lea.hbm %s931_s5, %s517_s14 }
  0x41   : > { %336 = vperm.xlu0 %582, %v333_v2   ;;  %v311_v8 = vsub.s32 %v308_v6, %v310_v7  ;;  %v298_v10 = vld [vmem:[%s294_s10] sm:$0xff]  ;;  %s378_s18 = scalar_lea.sflag [#allocation5], %s853_s16  ;;  %s621_s19 = scalar_lea.vmem %s879_s26, 128 }
  0x42   : > { %v356_v44 = vstv %s355_s12  ;;  %p622_p8 = scmp.ne.s32.totalorder %s879_s26, %s621_s19  ;;  %p940_p11 = scmp.ne.s32.totalorder %s935_s7, 0 }
  0x43   : > { %s708_s23 = smov [#allocation6]  }
  0x44   : > { %p623_p0 = pnand %p622_p8, %p940_p11  ;;  %s625_s6 = sshll.u32 %s708_s23, 4  ;;  %s626_s6 = int_to_ptr.vmem [resolvable:$false] %s625_s6 }
  0x45   : > { %s627_s29 = scalar_lea.vmem %s626_s6, 256  ;;  %p628_p13 = scmp.lt.s32.totalorder %s879_s26, %s626_s6 }
  0x46   : > { %p624_p7 = pneg %p623_p0  ;;  %p629_p3 = scmp.lt.s32.totalorder %s627_s29, %s621_s19 }
  0x48   : > { %p630_p6 = por %p629_p3, %p628_p13 }
  0x4a   : > { %p631_p4 = pnand %p630_p6, %p624_p7 }
  0xbc   : > { %v305_v9 = vpop.permute.xlu0 %304 }
  0xbd   : > { %v312_v11 = vrot.slane %v305_v9, %v311_v8 }
  0xbf   : > { %v314_v14 = vmul.f32 %v312_v11, %v298_v10 }
  0xc0   : > { %v337_v15 = vpop.permute.xlu0 %336 }
  0xc1   : > { %v316_v16 = vcombine.high %v314_v14, %v314_v14  ;;  %v319_v17 = vsel %vm318_vm0, %v314_v14, 0.0  ;;  %v339_v18 = vmul.f32 %v337_v15, %v299_v12  ;;  %v340_v19 = vmul.f32 %v337_v15, %v300_v13 }
  0xc2   : > { %v320_v20 = vrot.slane %v319_v17, 4 }
  0xc3   : > { %v326_v21 = vsel %vm318_vm0, %v316_v16, 0.0  ;;  %v341_v22 = vrot.slane %v339_v18, 4  ;;  %v347_v23 = vrot.slane %v340_v19, 4 }
  0xc4   : > { %v321_v24 = vadd.f32 %v320_v20, %v319_v17  ;;  %v327_v25 = vrot.slane %v326_v21, 4 }
  0xc5   : > { %v342_v26 = vadd.f32 %v341_v22, %v339_v18  ;;  %v348_v27 = vadd.f32 %v347_v23, %v340_v19 }
  0xc6   : > { %v322_v28 = vrot.slane %v321_v24, 2  ;;  %v328_v29 = vadd.f32 %v327_v25, %v326_v21 }
  0xc7   : > { %v343_v30 = vrot.slane %v342_v26, 2  ;;  %v349_v31 = vrot.slane %v348_v27, 2 }
  0xc8   : > { %v323_v32 = vadd.f32 %v322_v28, %v321_v24  ;;  %v329_v33 = vrot.slane %v328_v29, 2 }
  0xc9   : > { %v344_v34 = vadd.f32 %v343_v30, %v342_v26  ;;  %v350_v35 = vadd.f32 %v349_v31, %v348_v27 }
  0xca   : > { %v324_v36 = vrot.slane %v323_v32, 1  ;;  %v330_v37 = vadd.f32 %v329_v33, %v328_v29 }
  0xcb   : > { %v345_v38 = vrot.slane %v344_v34, 1  ;;  %v351_v39 = vrot.slane %v350_v35, 1 }
  0xcc   : > { %v325_v40 = vadd.f32 %v324_v36, %v323_v32  ;;  %v331_v41 = vrot.slane %v330_v37, 1 }
  0xcd   : > { %v346_v42 = vadd.f32 %v345_v38, %v344_v34  ;;  %v352_v43 = vadd.f32 %v351_v39, %v350_v35 }
  0xce   : > { %v332_v45 = vadd.f32 %v331_v41, %v330_v37 }
  0xcf   : > { %v353_v46 = vadd.f32 %v346_v42, %v325_v40 }
  0xd0   : > { %v354_v47 = vadd.f32 %v352_v43, %v332_v45 }
  0xd1   : > { %v357_v48 = vadd.f32 %v356_v44, %v353_v46 }
  0xd2   : > { %v358_v49 = vadd.f32 %v356_v44, %v354_v47 }
  0xd3   : > { %v508_v50 = vmul.f32 -1.442695, %v357_v48 }
  0xd4   : > { %v509_v51 = vmul.f32 -1.442695, %v358_v49 }
  0xd5   : > { %583 = vpow2.f32 %v508_v50 }
  0xd6   : > { %585 = vpow2.f32 %v509_v51 }
  0xdf   : > { %v584_v52 = vpop.eup %583 }
  0xe0   : > { %v586_v53 = vpop.eup %585  ;;  %v365_v54 = vadd.f32 1.0, %v584_v52 }
  0xe1   : > { %v366_v55 = vadd.f32 1.0, %v586_v53 }
  0xe2   : > { %587 = vrcp.f32 %v365_v54 }
  0xe3   : > { %589 = vrcp.f32 %v366_v55 }
  0xec   : > { %v588_v56 = vpop.eup %587 }
  0xed   : > { %v590_v57 = vpop.eup %589 }
  0xee   : > { %v373_v58 = vcombine.low %v588_v56, %v590_v57 }
  0xf0   : > { %v375_v59 = vmul.f32 %v373_v58, %v298_v10 }
  0xf2   : > { %376 = vst [vmem:[%s285_s4] sm:$0xff] %v375_v59 }
  0xf3   : > { %634 = shalt.err (!%p631_p4)
}
  0xf4   : > { %s635_s16 = scalar_lea.hbm %s877_s17, 128  ;;  %s639_s10 = scalar_lea.hbm %s931_s5, 256 }
  0xf5   : > { %p636_p10 = scmp.ne.s32.totalorder %s877_s17, %s635_s16  ;;  %p640_p2 = scmp.lt.u32.totalorder %s877_s17, %s931_s5 }
  0xf6   : > { %p641_p5 = scmp.lt.u32.totalorder %s639_s10, %s635_s16  ;;  %p643_p8 = scmp.lt.u32.totalorder %s635_s16, %s877_s17 }
  0xf7   : > { %p637_p12 = pnand %p636_p10, %p940_p11 }
  0xf8   : > { %p642_p9 = por %p641_p5, %p640_p2 }
  0xf9   : > { %p638_p1 = pneg %p637_p12 }
  0xfa   : > { %p644_p0 = por %p643_p8, %p642_p9 }
  0xfc   : > { %p645_p7 = pnand %p644_p0, %p638_p1 }
  0xfe   : > { %648 = shalt.err (!%p645_p7)
}
  0xff   : > { %520 = dma.vmem_to_hbm [thread:$0]  (%p940_p11), %s879_s26, 128, %s877_s17, %s378_s18  }
 0x100 PF: > { %s406_s14 = sand.u32 1, %s683_s20   ;;  %p941_p13 = scmp.ne.s32.totalorder %s936_s9, 0 }
 0x101   : > { %p942_p3 = scmp.ge.s32.totalorder %s703_s25, 2  ;;  %s407_s4 = scalar_lea.sflag [#allocation5], %s406_s14 }
 0x103   : > { %p527_p6 = pnand %p942_p3, %p941_p13 }
 0x105   : > { %678 = dma.done.wait (!%p527_p6), %s407_s4, 128  }
 0x106   : > { %680 = vsyncadd (!%p527_p6), %s407_s4, 4294967168  ;;  %s22_s25 = sadd.s32 1, %s703_s25   ;;  %s943_s20 = smov %s687_s21 }
 0x107   : > { %p19_p4 = scmp.ge.s32.totalorder %s22_s25, 4   ;;  %s944_s21 = smov %s691_s22 }
 0x108   : > { %s945_s22 = smov %s798_s8  ;;  %s946_s23 = smov %s699_s24 }
 0x109   : > { %s947_s24 = smov %s949_s27  ;;  %21 = sbr.rel (!%p19_p4) target bundleno = 8 (0x8), region = 88 }
 0x110   :  { %412 = vsyncpa [#allocation4], 1 }
 0x111   :  { %414 = vsyncpa [#allocation4 + $0x1], 1 }
 0x112   :  { %415 = vsyncpa [#allocation5], 1 }
 0x113   :  { %417 = vsyncpa [#allocation5 + $0x1], 1 }

</bundles_post_ra>
